<compile_context>
chip_gen: v6e
topology: v6e:2x2x1
jax: 0.10.0
libtpu: 0.0.40
codegen_flags: <defaults>
</compile_context>

<pallas_src>
import jax
import jax.numpy as jnp
from jax import lax
from jax.experimental import pallas as pl
from jax.experimental.pallas import tpu as pltpu


def _vmem_limit_bytes():
    """Per-generation scoped-VMEM limit (v5e/v6e: 128 MiB, v7x: 64 MiB)."""
    try:
        info = pltpu.get_tpu_info()
        return int(info.vmem_capacity_bytes) * 3 // 4
    except Exception:
        return 48 * 1024 * 1024


# ----------------------------------------------------------------------------
# Pallas kernel 1: ConvTranspose2d(kernel=2, stride=2) with the sub-pixel
# interleave fused into the output layout.  One whole image per grid step:
# (H*W, Cin) @ (Cin, 4*Cout) on the MXU (bf16 inputs, f32 accumulation), bias
# add in f32, bf16 stores into the interleaved block (1, H, 2, W, 2*Cout).
# ----------------------------------------------------------------------------
def _deconv_kernel(x_ref, w_ref, b_ref, o_ref):
    H = o_ref.shape[1]
    W = o_ref.shape[3]
    c2 = o_ref.shape[4]                                   # 2 * Cout
    y = jnp.dot(x_ref[0], w_ref[...],
                preferred_element_type=jnp.float32) + b_ref[...]
    for r in range(2):                                    # output-row parity
        # f32 reshape is a free sublane split (W is a multiple of 8); cast
        # to bf16 only at the store.
        o_ref[0, :, r, :, :] = (
            y[:, r * c2:(r + 1) * c2].reshape(H, W, c2).astype(o_ref.dtype))


def conv_transpose2x2(x_nhwc, up_w, up_b):
    """up_w: (Cin, 4*Cout) bf16, columns ordered (kh, kw, c); up_b: (1, 4*Cout) f32."""
    N, H, W, Cin = x_nhwc.shape
    Cout = up_w.shape[1] // 4
    x_flat = x_nhwc.reshape(N, H * W, Cin).astype(jnp.bfloat16)
    y = pl.pallas_call(
        _deconv_kernel,
        out_shape=jax.ShapeDtypeStruct((N, H, 2, W, 2 * Cout), jnp.bfloat16),
        grid=(N,),
        in_specs=[
            pl.BlockSpec((1, H * W, Cin), lambda n: (n, 0, 0)),
            pl.BlockSpec((Cin, 4 * Cout), lambda n: (0, 0)),
            pl.BlockSpec((1, 4 * Cout), lambda n: (0, 0)),
        ],
        out_specs=pl.BlockSpec((1, H, 2, W, 2 * Cout),
                               lambda n: (n, 0, 0, 0, 0)),
        compiler_params=pltpu.CompilerParams(
            dimension_semantics=("parallel",),
            vmem_limit_bytes=_vmem_limit_bytes()),
    )(x_flat, up_w, up_b)
    # (N, H, 2, W, 2*Cout) -> (N, 2H, 2W, Cout) is a pure (free) reshape:
    # no XLA transpose, no extra HBM round trip.
    return y.reshape(N, 2 * H, 2 * W, Cout)


# ----------------------------------------------------------------------------
# Pallas kernel 2: fused decoder block
#   concat([x_up, enc]) -> Conv3x3 -> ReLU -> Conv3x3 -> ReLU
# One image per grid step; halos (padding=1) and im2col slabs live in bf16
# VMEM scratch; each conv is a single MXU dot with K = 9 * Cin.
# ----------------------------------------------------------------------------
def _block_kernel(xup_ref, enc_ref, w1_ref, w2_ref, b1_ref, b2_ref, o_ref,
                  pad1_ref, pad2_ref, imc1_ref, imc2_ref):
    _, Hu, Wu, Cx = xup_ref.shape
    Ce = enc_ref.shape[-1]
    Ct = Cx + Ce
    Cm = o_ref.shape[-1]

    # Zero only the 1-pixel halo border; the interior is fully rewritten below.
    for ref, C in ((pad1_ref, Ct), (pad2_ref, Cm)):
        ref[0:1, :, :] = jnp.zeros((1, Wu + 2, C), ref.dtype)
        ref[Hu + 1:Hu + 2, :, :] = jnp.zeros((1, Wu + 2, C), ref.dtype)
        ref[:, 0:1, :] = jnp.zeros((Hu + 2, 1, C), ref.dtype)
        ref[:, Wu + 1:Wu + 2, :] = jnp.zeros((Hu + 2, 1, C), ref.dtype)

    # Channel concat realized directly in the padded scratch (no HBM concat).
    pad1_ref[1:Hu + 1, 1:Wu + 1, 0:Cx] = xup_ref[0]
    pad1_ref[1:Hu + 1, 1:Wu + 1, Cx:Ct] = enc_ref[0]

    # conv1 + ReLU: im2col (Hu*Wu, 9*Ct) then ONE MXU dot (f32 accumulate).
    for kh in range(3):
        for kw in range(3):
            t = kh * 3 + kw
            imc1_ref[:, t * Ct:(t + 1) * Ct] = (
                pad1_ref[kh:kh + Hu, kw:kw + Wu, :].reshape(Hu * Wu, Ct))
    h1 = jnp.dot(imc1_ref[...], w1_ref[...],
                 preferred_element_type=jnp.float32)
    h1 = jnp.maximum(h1 + b1_ref[...], 0.0)               # (Hu*Wu, Cm) f32

    # conv2 + ReLU, staged through the second padded scratch (no HBM trip).
    pad2_ref[1:Hu + 1, 1:Wu + 1, :] = (
        h1.reshape(Hu, Wu, Cm).astype(pad2_ref.dtype))
    for kh in range(3):
        for kw in range(3):
            t = kh * 3 + kw
            imc2_ref[:, t * Cm:(t + 1) * Cm] = (
                pad2_ref[kh:kh + Hu, kw:kw + Wu, :].reshape(Hu * Wu, Cm))
    h2 = jnp.dot(imc2_ref[...], w2_ref[...],
                 preferred_element_type=jnp.float32)
    # Single full-block store.
    o_ref[0] = jnp.maximum(h2 + b2_ref[...], 0.0).astype(o_ref.dtype)


def decoder_block(xup, enc, w1, b1, w2, b2, out_dtype=jnp.float32):
    """Fused Block(): ReLU(Conv3x3(cat([xup, enc]))) -> ReLU(Conv3x3(.))."""
    N, Hu, Wu, Cx = xup.shape
    Ce = enc.shape[-1]
    Ct = Cx + Ce
    Cm = w1.shape[-1]
    assert w1.shape[0] == 9 * Ct and w2.shape[0] == 9 * Cm

    out = pl.pallas_call(
        _block_kernel,
        out_shape=jax.ShapeDtypeStruct((N, Hu * Wu, Cm), out_dtype),
        grid=(N,),
        in_specs=[
            pl.BlockSpec((1, Hu, Wu, Cx), lambda n: (n, 0, 0, 0)),
            pl.BlockSpec((1, Hu, Wu, Ce), lambda n: (n, 0, 0, 0)),
            pl.BlockSpec((9 * Ct, Cm), lambda n: (0, 0)),
            pl.BlockSpec((9 * Cm, Cm), lambda n: (0, 0)),
            pl.BlockSpec((1, Cm), lambda n: (0, 0)),
            pl.BlockSpec((1, Cm), lambda n: (0, 0)),
        ],
        out_specs=pl.BlockSpec((1, Hu * Wu, Cm), lambda n: (n, 0, 0)),
        scratch_shapes=[
            pltpu.VMEM((Hu + 2, Wu + 2, Ct), jnp.bfloat16),   # padded concat
            pltpu.VMEM((Hu + 2, Wu + 2, Cm), jnp.bfloat16),   # padded conv1 out
            pltpu.VMEM((Hu * Wu, 9 * Ct), jnp.bfloat16),      # im2col conv1
            pltpu.VMEM((Hu * Wu, 9 * Cm), jnp.bfloat16),      # im2col conv2
        ],
        compiler_params=pltpu.CompilerParams(
            dimension_semantics=("parallel",),
            vmem_limit_bytes=_vmem_limit_bytes()),
    )(xup.astype(jnp.bfloat16), enc.astype(jnp.bfloat16), w1, w2, b1, b2)
    return out.reshape(N, Hu, Wu, Cm)                     # free, contiguous


# ----------------------------------------------------------------------------
# Decoder (parameters + forward)
# ----------------------------------------------------------------------------
def init_decoder_params(key, channels):
    params = []
    for i in range(len(channels) - 1):
        cin, cout = channels[i], channels[i + 1]
        key, *ks = jax.random.split(key, 7)
        params.append(dict(
            # PyTorch shapes: ConvTranspose2d.weight (Cin, Cout, 2, 2); Conv2d.weight (O, I, 3, 3)
            up_w=jax.random.normal(ks[0], (cin, cout, 2, 2), jnp.float32) * 0.1,
            up_b=jax.random.normal(ks[1], (cout,), jnp.float32) * 0.1,
            c1_w=jax.random.normal(ks[2], (cout, cin, 3, 3), jnp.float32) * 0.1,
            c1_b=jax.random.normal(ks[3], (cout,), jnp.float32) * 0.1,
            c2_w=jax.random.normal(ks[4], (cout, cout, 3, 3), jnp.float32) * 0.1,
            c2_b=jax.random.normal(ks[5], (cout,), jnp.float32) * 0.1,
        ))
    return params


def prepare_params(params):
    """Pre-reshape / pre-cast all weights into kernel-ready bf16 layouts once."""
    prepped = []
    for p in params:
        cin, cout = p["up_w"].shape[0], p["up_w"].shape[1]
        up_w = (jnp.transpose(p["up_w"], (0, 2, 3, 1))     # (Cin, kh, kw, Cout)
                .reshape(cin, 4 * cout).astype(jnp.bfloat16))
        up_b = jnp.tile(p["up_b"].astype(jnp.float32), 4).reshape(1, 4 * cout)
        # Conv2d weight (O, I, 3, 3) -> HWIO -> (9*I, O): taps major, channel
        # minor within a tap — matches the im2col column layout exactly, and
        # the I axis order [xup | enc] matches torch.cat(dim=1).
        w1 = (jnp.transpose(p["c1_w"], (2, 3, 1, 0))
              .reshape(9 * p["c1_w"].shape[1], p["c1_w"].shape[0])
              .astype(jnp.bfloat16))
        w2 = (jnp.transpose(p["c2_w"], (2, 3, 1, 0))
              .reshape(9 * p["c2_w"].shape[1], p["c2_w"].shape[0])
              .astype(jnp.bfloat16))
        b1 = p["c1_b"].reshape(1, -1).astype(jnp.float32)
        b2 = p["c2_b"].reshape(1, -1).astype(jnp.float32)
        prepped.append(dict(up_w=up_w, up_b=up_b, w1=w1, b1=b1, w2=w2, b2=b2))
    return prepped


def _crop(enc_nhwc, H, W):
    # torchvision T.Resize([H, W]); identity when spatial shapes already match.
    if enc_nhwc.shape[1] == H and enc_nhwc.shape[2] == W:
        return enc_nhwc
    return jax.image.resize(
        enc_nhwc, (enc_nhwc.shape[0], H, W, enc_nhwc.shape[3]), method="bilinear")


def decoder_forward(params, x_nchw, encoder_features_nchw):
    prepped = prepare_params(params)
    x = jnp.transpose(x_nchw, (0, 2, 3, 1))               # NCHW -> NHWC (once)
    encs = [jnp.transpose(e, (0, 2, 3, 1)) for e in encoder_features_nchw]
    n_stages = len(prepped)
    for i, p in enumerate(prepped):
        xup = conv_transpose2x2(x, p["up_w"], p["up_b"])  # bf16 NHWC
        enc = _crop(encs[i], xup.shape[1], xup.shape[2])
        # Intermediate-stage activations stay bf16; final stage is f32.
        out_dtype = jnp.bfloat16 if i + 1 < n_stages else jnp.float32
        x = decoder_block(xup, enc, p["w1"], p["b1"], p["w2"], p["b2"],
                          out_dtype=out_dtype)
    return jnp.transpose(x, (0, 3, 1, 2))                 # NHWC -> NCHW


def decoder_reference(params, x_nchw, encoder_features_nchw):
    """Pure-JAX reference with the same precision policy (bf16 dot inputs, f32 accum)."""
    x = jnp.transpose(x_nchw, (0, 2, 3, 1))
    for i, p in enumerate(params):
        N, H, W, _ = x.shape
        Cout = p["up_w"].shape[1]
        y = jnp.einsum("nhwi,iouv->nhuwvo",
                       x.astype(jnp.bfloat16), p["up_w"].astype(jnp.bfloat16),
                       preferred_element_type=jnp.float32)
        x = y.reshape(N, 2 * H, 2 * W, Cout) + p["up_b"]
        enc = jnp.transpose(encoder_features_nchw[i], (0, 2, 3, 1))
        enc = _crop(enc, x.shape[1], x.shape[2])
        x = jnp.concatenate([x, enc], axis=-1)
        for wk, bk in (("c1_w", "c1_b"), ("c2_w", "c2_b")):
            w = jnp.transpose(p[wk], (2, 3, 1, 0))
            out = lax.conv_general_dilated(
                x.astype(jnp.bfloat16), w.astype(jnp.bfloat16),
                window_strides=(1, 1), padding="SAME",
                dimension_numbers=("NHWC", "HWIO", "NHWC"),
                preferred_element_type=jnp.float32)
            x = jnp.maximum(out + p[bk], 0.0)
    return jnp.transpose(x, (0, 3, 1, 2))


if __name__ == "__main__":
    channels = (16, 8, 4)
    key = jax.random.PRNGKey(0)
    kp, kx, k0, k1 = jax.random.split(key, 4)
    params = init_decoder_params(kp, channels)

    N, H, W = 2, 8, 8
    # NCHW inputs, matching the PyTorch module's convention.
    x = jax.random.normal(kx, (N, channels[0], H, W), jnp.float32)
    encoder_features = [
        jax.random.normal(k0, (N, channels[0] - channels[1], 2 * H, 2 * W), jnp.float32),
        jax.random.normal(k1, (N, channels[1] - channels[2], 4 * H, 4 * W), jnp.float32),
    ]

    out = decoder_forward(params, x, encoder_features)
    out = jax.block_until_ready(out)

    assert out.shape == (N, channels[-1], 4 * H, 4 * W), out.shape
    ref = decoder_reference(params, x, encoder_features)
    max_err = float(jnp.max(jnp.abs(out - ref)))
    assert jnp.allclose(out, ref, atol=1e-2, rtol=1e-2), max_err

    print("KERNEL_OK")
</pallas_src>

<mosaic_0001>
module attributes {stable_mosaic.version = 11 : i64} {
  func.func @_deconv_kernel(%arg0: i32, %arg1: memref<1x64x16xbf16, #tpu.memory_space<vmem>>, %arg2: memref<16x32xbf16, #tpu.memory_space<vmem>>, %arg3: memref<1x32xf32, #tpu.memory_space<vmem>>, %arg4: memref<1x8x2x8x16xbf16, #tpu.memory_space<vmem>>) attributes {dimension_semantics = [#tpu.dimension_semantics<parallel>], iteration_bounds = array<i64: 2>, scalar_prefetch = 0 : i64, scratch_operands = 0 : i64, tpu.core_type = #tpu.core_type<tc>, window_params = [{transform_indices = @transform_0, window_bounds = array<i64: 1, 64, 16>}, {pipeline_mode = #tpu.pipeline_mode<synchronous>, transform_indices = @transform_1, window_bounds = array<i64: 16, 32>}, {pipeline_mode = #tpu.pipeline_mode<synchronous>, transform_indices = @transform_2, window_bounds = array<i64: 1, 32>}, {transform_indices = @transform_3, window_bounds = array<i64: 1, 8, 2, 8, 16>}]} {
    %c0 = arith.constant 0 : index
    %c0_0 = arith.constant 0 : index
    %c0_1 = arith.constant 0 : index
    %0 = vector.load %arg1[%c0, %c0_0, %c0_1] : memref<1x64x16xbf16, #tpu.memory_space<vmem>>, vector<1x64x16xbf16>
    %1 = vector.shape_cast %0 : vector<1x64x16xbf16> to vector<64x16xbf16>
    %c0_2 = arith.constant 0 : index
    %c0_3 = arith.constant 0 : index
    %2 = vector.load %arg2[%c0_2, %c0_3] : memref<16x32xbf16, #tpu.memory_space<vmem>>, vector<16x32xbf16>
    %cst = arith.constant dense<0.000000e+00> : vector<64x32xf32>
    %3 = tpu.matmul %1, %2, %cst {dimension_numbers = #tpu.dot_dimension_numbers<[1], [0], [0], [1], [0, 0, 1, 1], [], []>} : vector<64x16xbf16>, vector<16x32xbf16>, vector<64x32xf32> -> vector<64x32xf32>
    %c0_4 = arith.constant 0 : index
    %c0_5 = arith.constant 0 : index
    %4 = vector.load %arg3[%c0_4, %c0_5] : memref<1x32xf32, #tpu.memory_space<vmem>>, vector<1x32xf32>
    %5 = vector.broadcast %4 : vector<1x32xf32> to vector<64x32xf32>
    %6 = arith.addf %3, %5 : vector<64x32xf32>
    %7 = vector.extract_strided_slice %6 {offsets = [0, 0], sizes = [64, 16], strides = [1, 1]} : vector<64x32xf32> to vector<64x16xf32>
    %8 = vector.shape_cast %7 : vector<64x16xf32> to vector<8x8x16xf32>
    %9 = arith.truncf %8 : vector<8x8x16xf32> to vector<8x8x16xbf16>
    %c0_6 = arith.constant 0 : index
    %c0_7 = arith.constant 0 : index
    %c0_8 = arith.constant 0 : index
    %c0_9 = arith.constant 0 : index
    %c0_10 = arith.constant 0 : index
    %10 = vector.load %arg4[%c0_6, %c0_7, %c0_8, %c0_9, %c0_10] : memref<1x8x2x8x16xbf16, #tpu.memory_space<vmem>>, vector<1x8x1x8x16xbf16>
    %11 = vector.shape_cast %10 : vector<1x8x1x8x16xbf16> to vector<8x8x16xbf16>
    %12 = vector.shape_cast %9 : vector<8x8x16xbf16> to vector<1x8x1x8x16xbf16>
    tpu.vector_store %arg4[%c0_6, %c0_7, %c0_8, %c0_9, %c0_10], %12 {strides = array<i32>} : memref<1x8x2x8x16xbf16, #tpu.memory_space<vmem>>, vector<1x8x1x8x16xbf16>,
    %13 = vector.extract_strided_slice %6 {offsets = [0, 16], sizes = [64, 16], strides = [1, 1]} : vector<64x32xf32> to vector<64x16xf32>
    %14 = vector.shape_cast %13 : vector<64x16xf32> to vector<8x8x16xf32>
    %15 = arith.truncf %14 : vector<8x8x16xf32> to vector<8x8x16xbf16>
    %c0_11 = arith.constant 0 : index
    %c0_12 = arith.constant 0 : index
    %c1 = arith.constant 1 : index
    %c0_13 = arith.constant 0 : index
    %c0_14 = arith.constant 0 : index
    %16 = vector.load %arg4[%c0_11, %c0_12, %c1, %c0_13, %c0_14] : memref<1x8x2x8x16xbf16, #tpu.memory_space<vmem>>, vector<1x8x1x8x16xbf16>
    %17 = vector.shape_cast %16 : vector<1x8x1x8x16xbf16> to vector<8x8x16xbf16>
    %18 = vector.shape_cast %15 : vector<8x8x16xbf16> to vector<1x8x1x8x16xbf16>
    tpu.vector_store %arg4[%c0_11, %c0_12, %c1, %c0_13, %c0_14], %18 {strides = array<i32>} : memref<1x8x2x8x16xbf16, #tpu.memory_space<vmem>>, vector<1x8x1x8x16xbf16>,
    return
  }
  func.func @transform_0(%arg0: i32) -> (i32, i32, i32) {
    %c0_i32 = arith.constant 0 : i32
    %c0_i32_0 = arith.constant 0 : i32
    %c0_i32_1 = arith.constant 0 : i32
    return %arg0, %c0_i32, %c0_i32_0 : i32, i32, i32
  }
  func.func @transform_1(%arg0: i32) -> (i32, i32) {
    %c0_i32 = arith.constant 0 : i32
    %c0_i32_0 = arith.constant 0 : i32
    %c0_i32_1 = arith.constant 0 : i32
    return %c0_i32, %c0_i32_0 : i32, i32
  }
  func.func @transform_2(%arg0: i32) -> (i32, i32) {
    %c0_i32 = arith.constant 0 : i32
    %c0_i32_0 = arith.constant 0 : i32
    %c0_i32_1 = arith.constant 0 : i32
    return %c0_i32, %c0_i32_0 : i32, i32
  }
  func.func @transform_3(%arg0: i32) -> (i32, i32, i32, i32, i32) {
    %c0_i32 = arith.constant 0 : i32
    %c0_i32_0 = arith.constant 0 : i32
    %c0_i32_1 = arith.constant 0 : i32
    %c0_i32_2 = arith.constant 0 : i32
    %c0_i32_3 = arith.constant 0 : i32
    return %arg0, %c0_i32, %c0_i32_0, %c0_i32_1, %c0_i32_2 : i32, i32, i32, i32, i32
  }
}

</mosaic_0001>

<bundles_post_ra>
// kernel: tpu_custom_call.1
= control target key start
LH: loop header
LB: loop body
LE: loop exit
PB: predicated region body
PF: predicated region fallthrough
CT: control target
= control target key end

     0   :  { %8 = vsyncpa [#allocation3], 0  ;;  %s786_s0 = inlined_call_operand.vmem [shape: bf16[2,64,16], index: 0, kind: input, shape index: {}]   ;;  %s787_s1 = inlined_call_operand.vmem [shape: bf16[16,32], index: 1, kind: input, shape index: {}]   ;;  %s788_s2 = inlined_call_operand.vmem [shape: f32[1,32], index: 2, kind: input, shape index: {}]   ;;  %s789_s3 = inlined_call_operand.hbm [shape: bf16[2,8,2,8,16], index: 3, kind: output, shape index: {}]  }
   0x1   :  { %10 = vsyncpa [#allocation3 + $0x1], 0  ;;  %s639_s12 = smov 0   ;;  %s641_s13 = smov 0  }
   0x2   :  { %s643_s14 = smov 0   ;;  %s645_s15 = smov 0  }
   0x3 LB: > { %s660_s16 = sadd.s32 4294967295, %s613_s15   ;;  %s441_s17 = sadd.s32 4294967294, %s613_s15   ;;  %s613_s15 = sphi %s645_s15, %s795_s15   ;;  %s609_s14 = sphi %s643_s14, %s794_s14   ;;  %s605_s13 = sphi %s641_s13, %s793_s13   ;;  %s601_s12 = sphi %s639_s12, %s792_s12  }
   0x4   : > { %s664_s18 = sadd.s32 1, %s613_s15   ;;  %s91_s19 = sadd.s32 1, %s609_s14 }
   0x5   : > { %s88_s20 = ssub.s32 %s613_s15, %s664_s18  ;;  %p101_p0 = scmp.ne.s32.totalorder %s609_s14, %s605_s13 }
   0x6   : > { %p89_p1 = scmp.eq.s32.totalorder %s88_s20, 0  ;;  %p102_p2 = scmp.eq.s32.totalorder %s660_s16, 1 }
   0x7   : > { %p107_p3 = scmp.ne.s32.totalorder %s605_s13, %s601_s12  ;;  %p108_p4 = scmp.eq.s32.totalorder %s441_s17, 1 }
   0x8   : > { %s675_s21 = scalar_select %p89_p1, %s609_s14, %s91_s19  }
   0x9   : > { %p677_p5 = por %p102_p2, %p101_p0  ;;  %p681_p6 = por %p108_p4, %p107_p3 }
   0xa   : > { %p444_p7 = scmp.ge.s32.totalorder %s613_s15, 1  ;;  %p140_p8 = scmp.lt.s32.totalorder %s613_s15, 3 }
   0xc   : > { %p141_p9 = pnand %p444_p7, %p140_p8 }
   0xd   : > { %p164_p10 = scmp.lt.s32.totalorder (!%p141_p9), %s660_s16, 1  ;;  %s161_s4 = sand.u32 (!%p141_p9), 1, %s605_s13  }
   0xe   : > { %144 = sbr.rel (%p141_p9) target bundleno = 365 (0x16d), region = 32  ;;  %s445_s7 = sshll.u32 (!%p141_p9), %s161_s4, 6 }
   0xf   : > { %s701_s8 = scalar_lea.vmem (!%p141_p9), [#allocation2], %s445_s7  ;;  %s615_s9 = smov (!%p141_p9), 112  }
  0x10   : > { %s488_s10 = sshll.u32 (!%p141_p9), %s660_s16, 10  ;;  %s379_s11 = sshll.u32 (!%p141_p9), %s701_s8, 4  ;;  %s738_s11 = int_to_ptr.vmem [resolvable:$true] %s379_s11 }
  0x11   : > { %s736_s20 = scalar_lea.hbm (!%p141_p9), %s789_s3, %s488_s10  ;;  %s553_s24 = scalar_lea.vmem (!%p141_p9), %s738_s11, 1024 }
  0x12   : > { %p554_p11 = scmp.ne.s32.totalorder (!%p141_p9), %s738_s11, %s553_s24  ;;  %s616_s25 = smov (!%p141_p9), [#allocation2]  }
  0x13   : > { %v548_v0 = vld [vmem:[%s787_s1] sm:$0xff]   ;;  %s165_s26 = scalar_select %p164_p10, %s660_s16, 1  ;;  %vm213_vm0 = vcmask 130048   ;;  %vm299_vm1 = vcmask 125952  }
  0x14   : > { %494 = vmatprep.subr.bf16.mxu0 %v548_v0  ;;  %504 = vmatprep.subr.bf16.mxu1 %v548_v0  ;;  %v448_v5 = vld [vmem:[%s788_s2] ss:$0 sm:$0xff]  ;;  %s746_s16 = scalar_lea.sflag [#allocation3], %s161_s4  ;;  %p555_p12 = pnand %p554_p11, %p677_p5 }
  0x15   : > { %495 = vmatpush3.bf16.msra.mxu0 %v548_v0  ;;  %505 = vmatpush3.bf16.msra.mxu1 %v548_v0  ;;  %s479_s27 = sshll.u32 %s165_s26, 5  ;;  %s557_s26 = sshll.u32 %s616_s25, 4  ;;  %s558_s26 = int_to_ptr.vmem [resolvable:$false] %s557_s26 }
  0x16   : > { %s168_s30 = scalar_lea.vmem %s786_s0, %s479_s27  ;;  %p556_p13 = pneg %p555_p12 }
  0x17   : > { %v549_v1 = vld [vmem:[%s168_s30] sm:$0xff]   ;;  %v550_v2 = vld [vmem:[%s168_s30 + $0x10] sm:$0xff]   ;;  %v551_v3 = vld [vmem:[%s168_s30 + $0x8] sm:$0xff]   ;;  %s559_s27 = scalar_lea.vmem %s558_s26, 2048  ;;  %p560_p0 = scmp.lt.s32.totalorder %s738_s11, %s558_s26 }
  0x18   : > { %496 = vmatprep.mubr.msk.bf16.mxu0 %vm213_vm0, %v549_v1  ;;  %500 = vmatprep.mubr.msk.bf16.mxu1 %vm213_vm0, %v550_v2  ;;  %v552_v4 = vld [vmem:[%s168_s30 + $0x18] sm:$0xff]   ;;  %p561_p1 = scmp.lt.s32.totalorder %s559_s27, %s553_s24 }
  0x19   : > { %497 = vmatmul.mubr.msk.bf16.vlgmr.msra.gmra.mxu0 %vm213_vm0, %v551_v3  ;;  %501 = vmatmul.mubr.msk.bf16.vlgmr.msra.gmra.mxu1 %vm213_vm0, %v552_v4 }
  0x1a   : > { %p562_p2 = por %p561_p1, %p560_p0 }
  0x1c   : > { %p563_p3 = pnand %p562_p2, %p556_p13 }
  0xd9   : > { %v498_v6 = vpop.f32.mrf.mxu0  ;;  %v502_v8 = vpop.f32.mrf.mxu1 }
  0xda   : > { %v269_v7 = vadd.f32 %v498_v6, %v448_v5  ;;  %v285_v9 = vadd.f32 %v502_v8, %v448_v5 }
  0xdb   : > { %v260_v10 = vpop.f32.mrf.mxu0  ;;  %v276_v13 = vpop.f32.mrf.mxu1 }
  0xdc   : > { %v293_v11 = vpack.c.bf16 %v269_v7, %v269_v7  ;;  %v261_v12 = vadd.f32 %v448_v5, %v260_v10  ;;  %v297_v14 = vpack.c.bf16 %v285_v9, %v285_v9  ;;  %v277_v15 = vadd.f32 %v448_v5, %v276_v13 }
  0xdd   : > { %v499_v16 = vpop.f32.mrf.mxu0  ;;  %v503_v19 = vpop.f32.mrf.mxu1 }
  0xde   : > { %302 = vst.msk [vmem:[%s701_s8 + $0x10] sm:$0xf] %vm299_vm1, %v293_v11  ;;  %v291_v17 = vpack.c.bf16 %v261_v12, %v261_v12  ;;  %v272_v18 = vadd.f32 %v499_v16, %v448_v5  ;;  %336 = vrot.lane.b32.xlu1 %v293_v11, %s615_s9  ;;  %306 = vst.msk [vmem:[%s701_s8 + $0x30] sm:$0xf] %vm299_vm1, %v297_v14  ;;  %v295_v20 = vpack.c.bf16 %v277_v15, %v277_v15 }
  0xdf   : > { %v288_v21 = vadd.f32 %v503_v19, %v448_v5  ;;  %v263_v22 = vpop.f32.mrf.mxu0  ;;  %v279_v25 = vpop.f32.mrf.mxu1 }
  0xe0   : > { %300 = vst.msk [vmem:[%s701_s8] sm:$0xf] %vm299_vm1, %v291_v17  ;;  %v294_v23 = vpack.c.bf16 %v272_v18, %v272_v18  ;;  %v264_v24 = vadd.f32 %v448_v5, %v263_v22  ;;  %332 = vrot.lane.b32.xlu0 %v291_v17, %s615_s9  ;;  %304 = vst.msk [vmem:[%s701_s8 + $0x20] sm:$0xf] %vm299_vm1, %v295_v20  ;;  %v280_v27 = vadd.f32 %v448_v5, %v279_v25 }
  0xe1   : > { %v298_v26 = vpack.c.bf16 %v288_v21, %v288_v21 }
  0xe2   : > { %303 = vst.msk [vmem:[%s701_s8 + $0x18] sm:$0xf] %vm299_vm1, %v294_v23  ;;  %v292_v28 = vpack.c.bf16 %v264_v24, %v264_v24  ;;  %338 = vrot.lane.b32.xlu1 %v294_v23, %s615_s9  ;;  %v296_v29 = vpack.c.bf16 %v280_v27, %v280_v27 }
  0xe3   : > { %307 = vst.msk [vmem:[%s701_s8 + $0x38] sm:$0xf] %vm299_vm1, %v298_v26 }
  0xe4   : > { %301 = vst.msk [vmem:[%s701_s8 + $0x8] sm:$0xf] %vm299_vm1, %v292_v28  ;;  %340 = vrot.lane.b32.xlu0 %v295_v20, %s615_s9  ;;  %305 = vst.msk [vmem:[%s701_s8 + $0x28] sm:$0xf] %vm299_vm1, %v296_v29 }
  0xe6   : > { %342 = vrot.lane.b32.xlu1 %v296_v29, %s615_s9 }
  0xe8   : > { %334 = vrot.lane.b32.xlu0 %v292_v28, %s615_s9 }
  0xea   : > { %346 = vrot.lane.b32.xlu1 %v298_v26, %s615_s9 }
  0xec   : > { %344 = vrot.lane.b32.xlu0 %v297_v14, %s615_s9 }
 0x150   : > { %v337_v30 = vpop.permute.xlu1 %336 }
 0x151   : > { %468 = vst.msk [vmem:[%s701_s8 + $0x14] sm:$0xf] %vm299_vm1, %v337_v30 }
 0x152   : > { %v333_v31 = vpop.permute.xlu0 %332 }
 0x153   : > { %466 = vst.msk [vmem:[%s701_s8 + $0x4] sm:$0xf] %vm299_vm1, %v333_v31 }
 0x154   : > { %v339_v32 = vpop.permute.xlu1 %338 }
 0x155   : > { %469 = vst.msk [vmem:[%s701_s8 + $0x1c] sm:$0xf] %vm299_vm1, %v339_v32 }
 0x156   : > { %v341_v33 = vpop.permute.xlu0 %340 }
 0x157   : > { %470 = vst.msk [vmem:[%s701_s8 + $0x24] sm:$0xf] %vm299_vm1, %v341_v33 }
 0x158   : > { %v343_v34 = vpop.permute.xlu1 %342 }
 0x159   : > { %471 = vst.msk [vmem:[%s701_s8 + $0x2c] sm:$0xf] %vm299_vm1, %v343_v34 }
 0x15a   : > { %v335_v35 = vpop.permute.xlu0 %334 }
 0x15b   : > { %467 = vst.msk [vmem:[%s701_s8 + $0xc] sm:$0xf] %vm299_vm1, %v335_v35 }
 0x15c   : > { %v347_v36 = vpop.permute.xlu1 %346 }
 0x15d   : > { %473 = vst.msk [vmem:[%s701_s8 + $0x3c] sm:$0xf] %vm299_vm1, %v347_v36 }
 0x15e   : > { %v345_v37 = vpop.permute.xlu0 %344 }
 0x15f   : > { %472 = vst.msk [vmem:[%s701_s8 + $0x34] sm:$0xf] %vm299_vm1, %v345_v37 }
 0x160   : > { %566 = shalt.err (!%p563_p3)
}
 0x161   : > { %s567_s28 = scalar_lea.hbm %s736_s20, 1024  ;;  %s571_s4 = scalar_lea.hbm %s789_s3, 2048 }
 0x162   : > { %p568_p4 = scmp.ne.s32.totalorder %s736_s20, %s567_s28  ;;  %p572_p9 = scmp.lt.s32.totalorder %s736_s20, %s789_s3 }
 0x163   : > { %p573_p10 = scmp.lt.s32.totalorder %s571_s4, %s567_s28 }
 0x164   : > { %p569_p7 = pnand %p568_p4, %p677_p5 }
 0x165   : > { %p574_p11 = por %p573_p10, %p572_p9 }
 0x166   : > { %p570_p8 = pneg %p569_p7 }
 0x168   : > { %p575_p12 = pnand %p574_p11, %p570_p8 }
 0x16a   : > { %578 = shalt.err (!%p575_p12)
}
 0x16b   : > { %s617_s7 = smov 64   ;;  %s618_s8 = smov 4  }
 0x16c   : > { %506 = dma.vmem_to_hbm [thread:$0]  (%p677_p5), %s738_s11, 1024, %s736_s20, %s746_s16, %s617_s7, %s617_s7, %s618_s8  }
 0x16d PF: > { %p512_p13 = scmp.ge.s32.totalorder %s613_s15, 2  ;;  %s394_s9 = sand.u32 1, %s601_s12  }
 0x16e   : > { %s395_s10 = scalar_lea.sflag [#allocation3], %s394_s9 }
 0x16f   : > { %p509_p0 = pnand %p512_p13, %p681_p6 }
 0x171   : > { %p510_p1 = pneg %p509_p0 }
 0x173   : > { %596 = dma.done.wait (%p510_p1), %s395_s10, 1024  }
 0x174   : > { %598 = vsyncadd (%p510_p1), %s395_s10, 4294966272  ;;  %p13_p2 = scmp.ge.s32.totalorder %s664_s18, 4   ;;  %s792_s12 = smov %s605_s13 }
 0x175   : > { %s793_s13 = smov %s609_s14  ;;  %s794_s14 = smov %s675_s21 }
 0x176   : > { %s795_s15 = smov %s664_s18  ;;  %15 = sbr.rel (!%p13_p2) target bundleno = 3 (0x3), region = 68 }
 0x17b   :  { %400 = vsyncpa [#allocation3], 1 }
 0x17c   :  { %402 = vsyncpa [#allocation3 + $0x1], 1 }

</bundles_post_ra>
